<compile_context>
chip_gen: v6e
topology: v6e:2x2x1
jax: 0.10.0
libtpu: 0.0.40
codegen_flags: <defaults>
</compile_context>

<pallas_src>
import jax
import jax.numpy as jnp
from jax.experimental import pallas as pl
from jax.experimental.pallas import tpu as pltpu

_BN_EPS = 1e-5
_VMEM_LIMIT = 48 * 1024 * 1024      # fits v7x's 64 MiB physical VMEM with headroom
_VMEM_BUDGET = 40 * 1024 * 1024     # working-set target used to derive TILE_M


def _round_up(x, m):
    return ((x + m - 1) // m) * m


# ----------------------------- Pallas kernels ------------------------------

def _maxpool3_kernel(x_ref, o_ref):
    # x_ref: (1, T, 3, Wo, 3*C)  ->  o_ref: (1, T, Wo, C)
    c = o_ref.shape[-1]
    v = x_ref[...]
    # kh reduction: elementwise max over the 3 window rows (leading-dim indexing, cheap).
    r = jnp.maximum(jnp.maximum(v[:, :, 0], v[:, :, 1]), v[:, :, 2])       # (1, T, Wo, 3C)
    # kw reduction: static lane-group slices.
    o_ref[...] = jnp.maximum(jnp.maximum(r[..., :c], r[..., c:2 * c]), r[..., 2 * c:])


def _conv_matmul_stats_kernel(p_ref, w_ref, y_ref, mom_ref):
    # p_ref: (TM, K) bf16, w_ref: (K, C) bf16 (resident), y_ref: (TM, C) f32,
    # mom_ref: (1, 2, C) f32 per-tile [sum, sum-of-squares] partials for global BN stats.
    y = jnp.dot(p_ref[...], w_ref[...], preferred_element_type=jnp.float32)
    y_ref[...] = y
    mom = jnp.concatenate(
        [jnp.sum(y, axis=0, keepdims=True), jnp.sum(y * y, axis=0, keepdims=True)], axis=0)
    mom_ref[...] = mom.reshape(1, 2, y.shape[-1])


def _bn_relu_kernel(y_ref, s_ref, t_ref, o_ref):
    # Folded BN affine + ReLU: out = max(y * scale + shift, 0), cast to the output dtype.
    o_ref[...] = jnp.maximum(y_ref[...] * s_ref[...] + t_ref[...], 0.0).astype(o_ref.dtype)


# ------------------------------ Host wrappers -------------------------------

def maxpool3_nhwc(x):
    """MaxPool2d(kernel_size=3, stride=3, padding=0), NHWC, floor mode."""
    n, h, w, c = x.shape
    ho, wo = h // 3, w // 3
    x = x[:, : ho * 3, : wo * 3, :]
    xr = x.reshape(n, ho, 3, wo, 3 * c)                 # pure reshape, no HBM permute
    tile_ho = min(ho, 128)
    return pl.pallas_call(
        _maxpool3_kernel,
        out_shape=jax.ShapeDtypeStruct((n, ho, wo, c), x.dtype),
        grid_spec=pltpu.PrefetchScalarGridSpec(
            num_scalar_prefetch=0,
            grid=(n, pl.cdiv(ho, tile_ho)),
            in_specs=[pl.BlockSpec((1, tile_ho, 3, wo, 3 * c),
                                   lambda b, i: (b, i, 0, 0, 0))],
            out_specs=pl.BlockSpec((1, tile_ho, wo, c), lambda b, i: (b, i, 0, 0))),
        compiler_params=pltpu.CompilerParams(
            dimension_semantics=("parallel", "parallel"),
            vmem_limit_bytes=_VMEM_LIMIT),
    )(xr)


def _im2col_3x3(x):
    """NHWC (N,H,W,C) -> (N*H*W, C*9) patches, column index = (kh*3 + kw)*C + c."""
    # TODO(synk): form these patches in-kernel from a DMA'd (TILE_H+2)-row band (or as 9
    # shifted matmuls) so the 9x-expanded patch matrix never round-trips through HBM.
    n, h, w, c = x.shape
    xp = jnp.pad(x, ((0, 0), (1, 1), (1, 1), (0, 0)))
    cols = [xp[:, kh:kh + h, kw:kw + w, :] for kh in range(3) for kw in range(3)]
    return jnp.concatenate(cols, axis=-1).reshape(n * h * w, 9 * c)


def _pick_tile_m(m, k, cout):
    """Largest row tile (multiple of 8, <=512) whose pipelined working set fits the budget."""
    tile = min(512, _round_up(m, 8))
    while tile > 8:
        need = (2 * tile * k * 2          # double-buffered bf16 patch tiles
                + 2 * tile * cout * 4     # double-buffered f32 conv-output tiles
                + 2 * k * cout * 2        # resident bf16 weights
                + (1 << 20))
        if need <= _VMEM_BUDGET:
            break
        tile //= 2
    return max(8, _round_up(tile, 8))


def conv_bn_relu_nhwc(x, w, gamma, beta, *, out_dtype):
    """Conv2d(k=3, pad=1, bias folded away) + BatchNorm2d(train mode) + ReLU, NHWC."""
    n, h, wd, cin = x.shape
    cout = w.shape[0]
    m = n * h * wd
    k = cin * 9

    patches = _im2col_3x3(x.astype(jnp.bfloat16))                           # (M, K) bf16
    wm = jnp.transpose(w, (2, 3, 1, 0)).reshape(k, cout).astype(jnp.bfloat16)

    tile_m = _pick_tile_m(m, k, cout)
    mp = _round_up(m, tile_m)
    if mp != m:
        # Zero padding rows contribute nothing to the BN sums (we divide by the true M).
        patches = jnp.pad(patches, ((0, mp - m), (0, 0)))
    num_tiles = mp // tile_m

    # Pass 1: tiled matmul (bf16 in, f32 accumulate) + per-tile moment partials.
    cost1 = pl.CostEstimate(
        flops=2 * mp * k * cout, transcendentals=0,
        bytes_accessed=mp * k * 2 + k * cout * 2 + mp * cout * 4 + num_tiles * 2 * cout * 4)
    y, mom = pl.pallas_call(
        _conv_matmul_stats_kernel,
        out_shape=(jax.ShapeDtypeStruct((mp, cout), jnp.float32),
                   jax.ShapeDtypeStruct((num_tiles, 2, cout), jnp.float32)),
        grid_spec=pltpu.PrefetchScalarGridSpec(
            num_scalar_prefetch=0,
            grid=(num_tiles,),
            in_specs=[pl.BlockSpec((tile_m, k), lambda i: (i, 0)),
                      pl.BlockSpec((k, cout), lambda i: (0, 0))],   # weights stay resident
            out_specs=[pl.BlockSpec((tile_m, cout), lambda i: (i, 0)),
                       pl.BlockSpec((1, 2, cout), lambda i: (i, 0, 0))]),
        compiler_params=pltpu.CompilerParams(
            dimension_semantics=("parallel",),
            vmem_limit_bytes=_VMEM_LIMIT),
        cost_estimate=cost1,
    )(patches, wm)

    # Global training-mode BN statistics (biased variance) + folded affine (tiny, plain JAX).
    sums = jnp.sum(mom, axis=0)                                             # (2, Cout)
    mean = sums[0] / m
    var = jnp.maximum(sums[1] / m - mean * mean, 0.0)
    scale = (gamma * jax.lax.rsqrt(var + _BN_EPS)).astype(jnp.float32)
    shift = (beta - mean * scale).astype(jnp.float32)

    # Pass 2: fused normalize + ReLU over the same M grid.
    out = pl.pallas_call(
        _bn_relu_kernel,
        out_shape=jax.ShapeDtypeStruct((mp, cout), out_dtype),
        grid_spec=pltpu.PrefetchScalarGridSpec(
            num_scalar_prefetch=0,
            grid=(num_tiles,),
            in_specs=[pl.BlockSpec((tile_m, cout), lambda i: (i, 0)),
                      pl.BlockSpec((1, cout), lambda i: (0, 0)),
                      pl.BlockSpec((1, cout), lambda i: (0, 0))],
            out_specs=pl.BlockSpec((tile_m, cout), lambda i: (i, 0))),
        compiler_params=pltpu.CompilerParams(
            dimension_semantics=("parallel",),
            vmem_limit_bytes=_VMEM_LIMIT),
    )(y, scale.reshape(1, cout), shift.reshape(1, cout))

    return out[:m].reshape(n, h, wd, cout)


@jax.jit
def down_forward(x, params):
    """Down(in_ch, out_ch, poolk=3).forward(x); x is NCHW float32 (PyTorch layout)."""
    xh = jnp.transpose(x.astype(jnp.bfloat16), (0, 2, 3, 1))   # NCHW -> NHWC at the boundary
    y = maxpool3_nhwc(xh)
    y = conv_bn_relu_nhwc(y, params["w1"], params["g1"], params["be1"], out_dtype=jnp.bfloat16)
    y = conv_bn_relu_nhwc(y, params["w2"], params["g2"], params["be2"], out_dtype=jnp.float32)
    return jnp.transpose(y, (0, 3, 1, 2))                       # NHWC -> NCHW at the boundary


def init_params(key, in_channels, out_channels):
    mid_channels = out_channels
    ks = jax.random.split(key, 4)
    # Note: conv biases (b1/b2) are kept for interface parity with nn.Conv2d(bias=True) but
    # are NOT fed to the kernels: a bias added before training-mode BatchNorm cancels exactly
    # in the mean subtraction, so dropping it preserves the forward semantics.
    return {
        "w1": 0.1 * jax.random.normal(ks[0], (mid_channels, in_channels, 3, 3), jnp.float32),
        "b1": 0.1 * jax.random.normal(ks[1], (mid_channels,), jnp.float32),
        "g1": jnp.ones((mid_channels,), jnp.float32),
        "be1": jnp.zeros((mid_channels,), jnp.float32),
        "w2": 0.1 * jax.random.normal(ks[2], (out_channels, mid_channels, 3, 3), jnp.float32),
        "b2": 0.1 * jax.random.normal(ks[3], (out_channels,), jnp.float32),
        "g2": jnp.ones((out_channels,), jnp.float32),
        "be2": jnp.zeros((out_channels,), jnp.float32),
    }


if __name__ == "__main__":
    key = jax.random.PRNGKey(0)
    k_x, k_p = jax.random.split(key)

    N, C_IN, C_OUT, H, W = 2, 4, 8, 18, 18   # 18 -> 6 after MaxPool2d(3)
    x = jax.random.normal(k_x, (N, C_IN, H, W), dtype=jnp.float32)
    params = init_params(k_p, C_IN, C_OUT)

    out = down_forward(x, params)
    out = jax.block_until_ready(out)
    assert out.shape == (N, C_OUT, H // 3, W // 3), out.shape
    assert out.dtype == jnp.float32, out.dtype
    print("KERNEL_OK")
</pallas_src>

<mosaic_0001>
module attributes {stable_mosaic.version = 11 : i64} {
  func.func @_maxpool3_kernel(%arg0: i32, %arg1: i32, %arg2: memref<1x6x3x6x12xbf16, #tpu.memory_space<vmem>>, %arg3: memref<1x6x6x4xbf16, #tpu.memory_space<vmem>>) attributes {dimension_semantics = [#tpu.dimension_semantics<parallel>, #tpu.dimension_semantics<parallel>], iteration_bounds = array<i64: 2, 1>, scalar_prefetch = 0 : i64, scratch_operands = 0 : i64, tpu.core_type = #tpu.core_type<tc>, window_params = [{transform_indices = @transform_0, window_bounds = array<i64: 1, 6, 3, 6, 12>}, {transform_indices = @transform_1, window_bounds = array<i64: 1, 6, 6, 4>}]} {
    %c0 = arith.constant 0 : index
    %c0_0 = arith.constant 0 : index
    %c0_1 = arith.constant 0 : index
    %c0_2 = arith.constant 0 : index
    %c0_3 = arith.constant 0 : index
    %0 = vector.load %arg2[%c0, %c0_0, %c0_1, %c0_2, %c0_3] : memref<1x6x3x6x12xbf16, #tpu.memory_space<vmem>>, vector<1x6x3x6x12xbf16>
    %1 = vector.extract_strided_slice %0 {offsets = [0, 0, 0, 0, 0], sizes = [1, 6, 1, 6, 12], strides = [1, 1, 1, 1, 1]} : vector<1x6x3x6x12xbf16> to vector<1x6x1x6x12xbf16>
    %2 = vector.shape_cast %1 : vector<1x6x1x6x12xbf16> to vector<1x6x6x12xbf16>
    %3 = vector.extract_strided_slice %0 {offsets = [0, 0, 1, 0, 0], sizes = [1, 6, 1, 6, 12], strides = [1, 1, 1, 1, 1]} : vector<1x6x3x6x12xbf16> to vector<1x6x1x6x12xbf16>
    %4 = vector.shape_cast %3 : vector<1x6x1x6x12xbf16> to vector<1x6x6x12xbf16>
    %5 = arith.maximumf %2, %4 : vector<1x6x6x12xbf16>
    %6 = vector.extract_strided_slice %0 {offsets = [0, 0, 2, 0, 0], sizes = [1, 6, 1, 6, 12], strides = [1, 1, 1, 1, 1]} : vector<1x6x3x6x12xbf16> to vector<1x6x1x6x12xbf16>
    %7 = vector.shape_cast %6 : vector<1x6x1x6x12xbf16> to vector<1x6x6x12xbf16>
    %8 = arith.maximumf %5, %7 : vector<1x6x6x12xbf16>
    %9 = vector.extract_strided_slice %8 {offsets = [0, 0, 0, 0], sizes = [1, 6, 6, 4], strides = [1, 1, 1, 1]} : vector<1x6x6x12xbf16> to vector<1x6x6x4xbf16>
    %10 = vector.extract_strided_slice %8 {offsets = [0, 0, 0, 4], sizes = [1, 6, 6, 4], strides = [1, 1, 1, 1]} : vector<1x6x6x12xbf16> to vector<1x6x6x4xbf16>
    %11 = arith.maximumf %9, %10 : vector<1x6x6x4xbf16>
    %12 = vector.extract_strided_slice %8 {offsets = [0, 0, 0, 8], sizes = [1, 6, 6, 4], strides = [1, 1, 1, 1]} : vector<1x6x6x12xbf16> to vector<1x6x6x4xbf16>
    %13 = arith.maximumf %11, %12 : vector<1x6x6x4xbf16>
    %c0_4 = arith.constant 0 : index
    %c0_5 = arith.constant 0 : index
    %c0_6 = arith.constant 0 : index
    %c0_7 = arith.constant 0 : index
    %14 = vector.load %arg3[%c0_4, %c0_5, %c0_6, %c0_7] : memref<1x6x6x4xbf16, #tpu.memory_space<vmem>>, vector<1x6x6x4xbf16>
    tpu.vector_store %arg3[%c0_4, %c0_5, %c0_6, %c0_7], %13 {strides = array<i32>} : memref<1x6x6x4xbf16, #tpu.memory_space<vmem>>, vector<1x6x6x4xbf16>,
    return
  }
  func.func @transform_0(%arg0: i32, %arg1: i32) -> (i32, i32, i32, i32, i32) {
    %c0_i32 = arith.constant 0 : i32
    %c0_i32_0 = arith.constant 0 : i32
    %c0_i32_1 = arith.constant 0 : i32
    %c0_i32_2 = arith.constant 0 : i32
    return %arg0, %arg1, %c0_i32, %c0_i32_0, %c0_i32_1 : i32, i32, i32, i32, i32
  }
  func.func @transform_1(%arg0: i32, %arg1: i32) -> (i32, i32, i32, i32) {
    %c0_i32 = arith.constant 0 : i32
    %c0_i32_0 = arith.constant 0 : i32
    %c0_i32_1 = arith.constant 0 : i32
    return %arg0, %arg1, %c0_i32, %c0_i32_0 : i32, i32, i32, i32
  }
}

module attributes {stable_mosaic.version = 11 : i64} {
  func.func @_conv_matmul_stats_kernel(%arg0: i32, %arg1: memref<72x36xbf16, #tpu.memory_space<vmem>>, %arg2: memref<36x8xbf16, #tpu.memory_space<vmem>>, %arg3: memref<72x8xf32, #tpu.memory_space<vmem>>, %arg4: memref<1x2x8xf32, #tpu.memory_space<vmem>>) attributes {dimension_semantics = [#tpu.dimension_semantics<parallel>], iteration_bounds = array<i64: 1>, scalar_prefetch = 0 : i64, scratch_operands = 0 : i64, tpu.core_type = #tpu.core_type<tc>, window_params = [{transform_indices = @transform_0, window_bounds = array<i64: 72, 36>}, {pipeline_mode = #tpu.pipeline_mode<synchronous>, transform_indices = @transform_1, window_bounds = array<i64: 36, 8>}, {transform_indices = @transform_2, window_bounds = array<i64: 72, 8>}, {transform_indices = @transform_3, window_bounds = array<i64: 1, 2, 8>}]} {
    %c0 = arith.constant 0 : index
    %c0_0 = arith.constant 0 : index
    %0 = vector.load %arg1[%c0, %c0_0] : memref<72x36xbf16, #tpu.memory_space<vmem>>, vector<72x36xbf16>
    %c0_1 = arith.constant 0 : index
    %c0_2 = arith.constant 0 : index
    %1 = vector.load %arg2[%c0_1, %c0_2] : memref<36x8xbf16, #tpu.memory_space<vmem>>, vector<36x8xbf16>
    %cst = arith.constant dense<0.000000e+00> : vector<72x8xf32>
    %2 = tpu.matmul %0, %1, %cst {dimension_numbers = #tpu.dot_dimension_numbers<[1], [0], [0], [1], [0, 0, 1, 1], [], []>} : vector<72x36xbf16>, vector<36x8xbf16>, vector<72x8xf32> -> vector<72x8xf32>
    %c0_3 = arith.constant 0 : index
    %c0_4 = arith.constant 0 : index
    %3 = vector.load %arg3[%c0_3, %c0_4] : memref<72x8xf32, #tpu.memory_space<vmem>>, vector<72x8xf32>
    tpu.vector_store %arg3[%c0_3, %c0_4], %2 {strides = array<i32>} : memref<72x8xf32, #tpu.memory_space<vmem>>, vector<72x8xf32>,
    %cst_5 = arith.constant dense<0.000000e+00> : vector<8xf32>
    %4 = vector.multi_reduction <add>, %2, %cst_5 [0] : vector<72x8xf32> to vector<8xf32>
    %5 = vector.shape_cast %4 : vector<8xf32> to vector<1x8xf32>
    %6 = arith.mulf %2, %2 : vector<72x8xf32>
    %cst_6 = arith.constant dense<0.000000e+00> : vector<8xf32>
    %7 = vector.multi_reduction <add>, %6, %cst_6 [0] : vector<72x8xf32> to vector<8xf32>
    %8 = vector.shape_cast %7 : vector<8xf32> to vector<1x8xf32>
    %9 = tpu.concatenate %5, %8 in 0 : vector<1x8xf32>, vector<1x8xf32> -> vector<2x8xf32>
    %10 = vector.shape_cast %9 : vector<2x8xf32> to vector<1x2x8xf32>
    %c0_7 = arith.constant 0 : index
    %c0_8 = arith.constant 0 : index
    %c0_9 = arith.constant 0 : index
    %11 = vector.load %arg4[%c0_7, %c0_8, %c0_9] : memref<1x2x8xf32, #tpu.memory_space<vmem>>, vector<1x2x8xf32>
    tpu.vector_store %arg4[%c0_7, %c0_8, %c0_9], %10 {strides = array<i32>} : memref<1x2x8xf32, #tpu.memory_space<vmem>>, vector<1x2x8xf32>,
    return
  }
  func.func @transform_0(%arg0: i32) -> (i32, i32) {
    %c0_i32 = arith.constant 0 : i32
    %c0_i32_0 = arith.constant 0 : i32
    return %arg0, %c0_i32 : i32, i32
  }
  func.func @transform_1(%arg0: i32) -> (i32, i32) {
    %c0_i32 = arith.constant 0 : i32
    %c0_i32_0 = arith.constant 0 : i32
    %c0_i32_1 = arith.constant 0 : i32
    return %c0_i32, %c0_i32_0 : i32, i32
  }
  func.func @transform_2(%arg0: i32) -> (i32, i32) {
    %c0_i32 = arith.constant 0 : i32
    %c0_i32_0 = arith.constant 0 : i32
    return %arg0, %c0_i32 : i32, i32
  }
  func.func @transform_3(%arg0: i32) -> (i32, i32, i32) {
    %c0_i32 = arith.constant 0 : i32
    %c0_i32_0 = arith.constant 0 : i32
    %c0_i32_1 = arith.constant 0 : i32
    return %arg0, %c0_i32, %c0_i32_0 : i32, i32, i32
  }
}

module attributes {stable_mosaic.version = 11 : i64} {
  func.func @_bn_relu_kernel(%arg0: i32, %arg1: memref<72x8xf32, #tpu.memory_space<vmem>>, %arg2: memref<1x8xf32, #tpu.memory_space<vmem>>, %arg3: memref<1x8xf32, #tpu.memory_space<vmem>>, %arg4: memref<72x8xbf16, #tpu.memory_space<vmem>>) attributes {dimension_semantics = [#tpu.dimension_semantics<parallel>], iteration_bounds = array<i64: 1>, scalar_prefetch = 0 : i64, scratch_operands = 0 : i64, tpu.core_type = #tpu.core_type<tc>, window_params = [{transform_indices = @transform_0, window_bounds = array<i64: 72, 8>}, {pipeline_mode = #tpu.pipeline_mode<synchronous>, transform_indices = @transform_1, window_bounds = array<i64: 1, 8>}, {pipeline_mode = #tpu.pipeline_mode<synchronous>, transform_indices = @transform_2, window_bounds = array<i64: 1, 8>}, {transform_indices = @transform_3, window_bounds = array<i64: 72, 8>}]} {
    %c0 = arith.constant 0 : index
    %c0_0 = arith.constant 0 : index
    %0 = vector.load %arg1[%c0, %c0_0] : memref<72x8xf32, #tpu.memory_space<vmem>>, vector<72x8xf32>
    %c0_1 = arith.constant 0 : index
    %c0_2 = arith.constant 0 : index
    %1 = vector.load %arg2[%c0_1, %c0_2] : memref<1x8xf32, #tpu.memory_space<vmem>>, vector<1x8xf32>
    %2 = vector.broadcast %1 : vector<1x8xf32> to vector<72x8xf32>
    %3 = arith.mulf %0, %2 : vector<72x8xf32>
    %c0_3 = arith.constant 0 : index
    %c0_4 = arith.constant 0 : index
    %4 = vector.load %arg3[%c0_3, %c0_4] : memref<1x8xf32, #tpu.memory_space<vmem>>, vector<1x8xf32>
    %5 = vector.broadcast %4 : vector<1x8xf32> to vector<72x8xf32>
    %6 = arith.addf %3, %5 : vector<72x8xf32>
    %cst = arith.constant 0.000000e+00 : f32
    %7 = vector.broadcast %cst : f32 to vector<72x8xf32>
    %8 = arith.maximumf %6, %7 : vector<72x8xf32>
    %9 = arith.truncf %8 : vector<72x8xf32> to vector<72x8xbf16>
    %c0_5 = arith.constant 0 : index
    %c0_6 = arith.constant 0 : index
    %10 = vector.load %arg4[%c0_5, %c0_6] : memref<72x8xbf16, #tpu.memory_space<vmem>>, vector<72x8xbf16>
    tpu.vector_store %arg4[%c0_5, %c0_6], %9 {strides = array<i32>} : memref<72x8xbf16, #tpu.memory_space<vmem>>, vector<72x8xbf16>,
    return
  }
  func.func @transform_0(%arg0: i32) -> (i32, i32) {
    %c0_i32 = arith.constant 0 : i32
    %c0_i32_0 = arith.constant 0 : i32
    return %arg0, %c0_i32 : i32, i32
  }
  func.func @transform_1(%arg0: i32) -> (i32, i32) {
    %c0_i32 = arith.constant 0 : i32
    %c0_i32_0 = arith.constant 0 : i32
    %c0_i32_1 = arith.constant 0 : i32
    return %c0_i32, %c0_i32_0 : i32, i32
  }
  func.func @transform_2(%arg0: i32) -> (i32, i32) {
    %c0_i32 = arith.constant 0 : i32
    %c0_i32_0 = arith.constant 0 : i32
    %c0_i32_1 = arith.constant 0 : i32
    return %c0_i32, %c0_i32_0 : i32, i32
  }
  func.func @transform_3(%arg0: i32) -> (i32, i32) {
    %c0_i32 = arith.constant 0 : i32
    %c0_i32_0 = arith.constant 0 : i32
    return %arg0, %c0_i32 : i32, i32
  }
}

module attributes {stable_mosaic.version = 11 : i64} {
  func.func @_conv_matmul_stats_kernel(%arg0: i32, %arg1: memref<72x72xbf16, #tpu.memory_space<vmem>>, %arg2: memref<72x8xbf16, #tpu.memory_space<vmem>>, %arg3: memref<72x8xf32, #tpu.memory_space<vmem>>, %arg4: memref<1x2x8xf32, #tpu.memory_space<vmem>>) attributes {dimension_semantics = [#tpu.dimension_semantics<parallel>], iteration_bounds = array<i64: 1>, scalar_prefetch = 0 : i64, scratch_operands = 0 : i64, tpu.core_type = #tpu.core_type<tc>, window_params = [{transform_indices = @transform_0, window_bounds = array<i64: 72, 72>}, {pipeline_mode = #tpu.pipeline_mode<synchronous>, transform_indices = @transform_1, window_bounds = array<i64: 72, 8>}, {transform_indices = @transform_2, window_bounds = array<i64: 72, 8>}, {transform_indices = @transform_3, window_bounds = array<i64: 1, 2, 8>}]} {
    %c0 = arith.constant 0 : index
    %c0_0 = arith.constant 0 : index
    %0 = vector.load %arg1[%c0, %c0_0] : memref<72x72xbf16, #tpu.memory_space<vmem>>, vector<72x72xbf16>
    %c0_1 = arith.constant 0 : index
    %c0_2 = arith.constant 0 : index
    %1 = vector.load %arg2[%c0_1, %c0_2] : memref<72x8xbf16, #tpu.memory_space<vmem>>, vector<72x8xbf16>
    %cst = arith.constant dense<0.000000e+00> : vector<72x8xf32>
    %2 = tpu.matmul %0, %1, %cst {dimension_numbers = #tpu.dot_dimension_numbers<[1], [0], [0], [1], [0, 0, 1, 1], [], []>} : vector<72x72xbf16>, vector<72x8xbf16>, vector<72x8xf32> -> vector<72x8xf32>
    %c0_3 = arith.constant 0 : index
    %c0_4 = arith.constant 0 : index
    %3 = vector.load %arg3[%c0_3, %c0_4] : memref<72x8xf32, #tpu.memory_space<vmem>>, vector<72x8xf32>
    tpu.vector_store %arg3[%c0_3, %c0_4], %2 {strides = array<i32>} : memref<72x8xf32, #tpu.memory_space<vmem>>, vector<72x8xf32>,
    %cst_5 = arith.constant dense<0.000000e+00> : vector<8xf32>
    %4 = vector.multi_reduction <add>, %2, %cst_5 [0] : vector<72x8xf32> to vector<8xf32>
    %5 = vector.shape_cast %4 : vector<8xf32> to vector<1x8xf32>
    %6 = arith.mulf %2, %2 : vector<72x8xf32>
    %cst_6 = arith.constant dense<0.000000e+00> : vector<8xf32>
    %7 = vector.multi_reduction <add>, %6, %cst_6 [0] : vector<72x8xf32> to vector<8xf32>
    %8 = vector.shape_cast %7 : vector<8xf32> to vector<1x8xf32>
    %9 = tpu.concatenate %5, %8 in 0 : vector<1x8xf32>, vector<1x8xf32> -> vector<2x8xf32>
    %10 = vector.shape_cast %9 : vector<2x8xf32> to vector<1x2x8xf32>
    %c0_7 = arith.constant 0 : index
    %c0_8 = arith.constant 0 : index
    %c0_9 = arith.constant 0 : index
    %11 = vector.load %arg4[%c0_7, %c0_8, %c0_9] : memref<1x2x8xf32, #tpu.memory_space<vmem>>, vector<1x2x8xf32>
    tpu.vector_store %arg4[%c0_7, %c0_8, %c0_9], %10 {strides = array<i32>} : memref<1x2x8xf32, #tpu.memory_space<vmem>>, vector<1x2x8xf32>,
    return
  }
  func.func @transform_0(%arg0: i32) -> (i32, i32) {
    %c0_i32 = arith.constant 0 : i32
    %c0_i32_0 = arith.constant 0 : i32
    return %arg0, %c0_i32 : i32, i32
  }
  func.func @transform_1(%arg0: i32) -> (i32, i32) {
    %c0_i32 = arith.constant 0 : i32
    %c0_i32_0 = arith.constant 0 : i32
    %c0_i32_1 = arith.constant 0 : i32
    return %c0_i32, %c0_i32_0 : i32, i32
  }
  func.func @transform_2(%arg0: i32) -> (i32, i32) {
    %c0_i32 = arith.constant 0 : i32
    %c0_i32_0 = arith.constant 0 : i32
    return %arg0, %c0_i32 : i32, i32
  }
  func.func @transform_3(%arg0: i32) -> (i32, i32, i32) {
    %c0_i32 = arith.constant 0 : i32
    %c0_i32_0 = arith.constant 0 : i32
    %c0_i32_1 = arith.constant 0 : i32
    return %arg0, %c0_i32, %c0_i32_0 : i32, i32, i32
  }
}

module attributes {stable_mosaic.version = 11 : i64} {
  func.func @_bn_relu_kernel(%arg0: i32, %arg1: memref<72x8xf32, #tpu.memory_space<vmem>>, %arg2: memref<1x8xf32, #tpu.memory_space<vmem>>, %arg3: memref<1x8xf32, #tpu.memory_space<vmem>>, %arg4: memref<72x8xf32, #tpu.memory_space<vmem>>) attributes {dimension_semantics = [#tpu.dimension_semantics<parallel>], iteration_bounds = array<i64: 1>, scalar_prefetch = 0 : i64, scratch_operands = 0 : i64, tpu.core_type = #tpu.core_type<tc>, window_params = [{transform_indices = @transform_0, window_bounds = array<i64: 72, 8>}, {pipeline_mode = #tpu.pipeline_mode<synchronous>, transform_indices = @transform_1, window_bounds = array<i64: 1, 8>}, {pipeline_mode = #tpu.pipeline_mode<synchronous>, transform_indices = @transform_2, window_bounds = array<i64: 1, 8>}, {transform_indices = @transform_3, window_bounds = array<i64: 72, 8>}]} {
    %c0 = arith.constant 0 : index
    %c0_0 = arith.constant 0 : index
    %0 = vector.load %arg1[%c0, %c0_0] : memref<72x8xf32, #tpu.memory_space<vmem>>, vector<72x8xf32>
    %c0_1 = arith.constant 0 : index
    %c0_2 = arith.constant 0 : index
    %1 = vector.load %arg2[%c0_1, %c0_2] : memref<1x8xf32, #tpu.memory_space<vmem>>, vector<1x8xf32>
    %2 = vector.broadcast %1 : vector<1x8xf32> to vector<72x8xf32>
    %3 = arith.mulf %0, %2 : vector<72x8xf32>
    %c0_3 = arith.constant 0 : index
    %c0_4 = arith.constant 0 : index
    %4 = vector.load %arg3[%c0_3, %c0_4] : memref<1x8xf32, #tpu.memory_space<vmem>>, vector<1x8xf32>
    %5 = vector.broadcast %4 : vector<1x8xf32> to vector<72x8xf32>
    %6 = arith.addf %3, %5 : vector<72x8xf32>
    %cst = arith.constant 0.000000e+00 : f32
    %7 = vector.broadcast %cst : f32 to vector<72x8xf32>
    %8 = arith.maximumf %6, %7 : vector<72x8xf32>
    %c0_5 = arith.constant 0 : index
    %c0_6 = arith.constant 0 : index
    %9 = vector.load %arg4[%c0_5, %c0_6] : memref<72x8xf32, #tpu.memory_space<vmem>>, vector<72x8xf32>
    tpu.vector_store %arg4[%c0_5, %c0_6], %8 {strides = array<i32>} : memref<72x8xf32, #tpu.memory_space<vmem>>, vector<72x8xf32>,
    return
  }
  func.func @transform_0(%arg0: i32) -> (i32, i32) {
    %c0_i32 = arith.constant 0 : i32
    %c0_i32_0 = arith.constant 0 : i32
    return %arg0, %c0_i32 : i32, i32
  }
  func.func @transform_1(%arg0: i32) -> (i32, i32) {
    %c0_i32 = arith.constant 0 : i32
    %c0_i32_0 = arith.constant 0 : i32
    %c0_i32_1 = arith.constant 0 : i32
    return %c0_i32, %c0_i32_0 : i32, i32
  }
  func.func @transform_2(%arg0: i32) -> (i32, i32) {
    %c0_i32 = arith.constant 0 : i32
    %c0_i32_0 = arith.constant 0 : i32
    %c0_i32_1 = arith.constant 0 : i32
    return %c0_i32, %c0_i32_0 : i32, i32
  }
  func.func @transform_3(%arg0: i32) -> (i32, i32) {
    %c0_i32 = arith.constant 0 : i32
    %c0_i32_0 = arith.constant 0 : i32
    return %arg0, %c0_i32 : i32, i32
  }
}

</mosaic_0001>

<bundles_post_ra>
// kernel: down_forward.5
= control target key start
LH: loop header
LB: loop body
LE: loop exit
PB: predicated region body
PF: predicated region fallthrough
CT: control target
= control target key end

     0   :  { %s413_s6 = smov 0   ;;  %s415_s7 = smov 0   ;;  %s476_s0 = inlined_call_operand.vmem [shape: bf16[2,6,3,6,12], index: 0, kind: input, shape index: {}]   ;;  %s477_s1 = inlined_call_operand.vmem [shape: bf16[2,6,6,4], index: 1, kind: output, shape index: {}]  }
   0x1   :  { %s417_s8 = smov 0  }
   0x2 LB: > { %s23_s9 = sadd.s32 1, %s395_s7  ;;  %p344_p0 = scmp.ge.s32.totalorder %s399_s8, 1  ;;  %s399_s8 = sphi %s417_s8, %s11_s8   ;;  %s395_s7 = sphi %s415_s7, %s479_s7   ;;  %s391_s6 = sphi %s413_s6, %s478_s6  }
   0x3   : > { %p25_p1 = scmp.ge.s32.totalorder %s23_s9, 2  ;;  %p109_p2 = scmp.lt.s32.totalorder %s399_s8, 3 }
   0x5   : > { %s481_s9 = smov (%p25_p1, %s23_s9), 0  ;;  %p110_p3 = pnand %p344_p0, %p109_p2 }
   0x6   : > { %p139_p4 = scmp.lt.s32.totalorder (!%p110_p3), %s391_s6, 1  ;;  %s401_s14 = smov (!%p110_p3), 124  }
   0x7   : > { %113 = sbr.rel (%p110_p3) target bundleno = 160 (0xa0), region = 24  ;;  %s402_s15 = smov (!%p110_p3), 120  }
   0xc   : > { %s483_s6 = smov (!%p139_p4, %s391_s6), 1  ;;  %vm243_vm0 = vcmask 26624  }
   0xd   : > { %s349_s10 = smul.u32 72, %s483_s6 }
   0xe   : > { %s350_s16 = smul.u32 24, %s483_s6 }
   0xf   : > { %s437_s13 = scalar_lea.vmem %s476_s0, %s349_s10 }
  0x10   : > { %v165_v0 = vld [vmem:[%s437_s13 + $0x18] sm:$0x7]  ;;  %v166_v1 = vld [vmem:[%s437_s13 + $0x1c] sm:$0x7]  ;;  %v167_v2 = vld [vmem:[%s437_s13 + $0x20] sm:$0x7]  ;;  %s157_s19 = scalar_lea.vmem %s477_s1, %s350_s16 }
  0x11   : > { %v179_v3 = vmax.bf16 %v166_v1, %v165_v0  ;;  %v159_v4 = vld [vmem:[%s437_s13] sm:$0x7]  ;;  %v160_v5 = vld [vmem:[%s437_s13 + $0x4] sm:$0x7]  ;;  %v161_v6 = vld [vmem:[%s437_s13 + $0x8] sm:$0x7] }
  0x12   : > { %v177_v7 = vmax.bf16 %v160_v5, %v159_v4  ;;  %v168_v8 = vld [vmem:[%s437_s13 + $0x24] sm:$0x7]  ;;  %v169_v9 = vld [vmem:[%s437_s13 + $0x28] sm:$0x7]  ;;  %v170_v10 = vld [vmem:[%s437_s13 + $0x2c] sm:$0x7] }
  0x13   : > { %v185_v11 = vmax.bf16 %v179_v3, %v167_v2  ;;  %v180_v12 = vmax.bf16 %v169_v9, %v168_v8  ;;  %v162_v13 = vld [vmem:[%s437_s13 + $0xc] sm:$0x7]  ;;  %v163_v14 = vld [vmem:[%s437_s13 + $0x10] sm:$0x7]  ;;  %v164_v15 = vld [vmem:[%s437_s13 + $0x14] sm:$0x7] }
  0x14   : > { %v183_v16 = vmax.bf16 %v177_v7, %v161_v6  ;;  %v178_v17 = vmax.bf16 %v163_v14, %v162_v13  ;;  %v174_v18 = vld [vmem:[%s437_s13 + $0x3c] sm:$0x7]  ;;  %v175_v19 = vld [vmem:[%s437_s13 + $0x40] sm:$0x7]  ;;  %v171_v22 = vld [vmem:[%s437_s13 + $0x30] sm:$0x7] }
  0x15   : > { %199 = vrot.lane.b32.xlu1 %v185_v11, %s401_s14  ;;  %v186_v20 = vmax.bf16 %v180_v12, %v170_v10  ;;  %v182_v21 = vmax.bf16 %v175_v19, %v174_v18  ;;  %v172_v23 = vld [vmem:[%s437_s13 + $0x34] sm:$0x7]  ;;  %v176_v25 = vld [vmem:[%s437_s13 + $0x44] sm:$0x7]  ;;  %v173_v27 = vld [vmem:[%s437_s13 + $0x38] sm:$0x7] }
  0x16   : > { %195 = vrot.lane.b32.xlu0 %v183_v16, %s401_s14  ;;  %v184_v24 = vmax.bf16 %v178_v17, %v164_v15  ;;  %v181_v26 = vmax.bf16 %v172_v23, %v171_v22 }
  0x17   : > { %v188_v28 = vmax.bf16 %v182_v21, %v176_v25 }
  0x18   : > { %v187_v29 = vmax.bf16 %v181_v26, %v173_v27 }
  0x19   : > { %201 = vrot.lane.b32.xlu1 %v186_v20, %s401_s14 }
  0x1a   : > { %197 = vrot.lane.b32.xlu0 %v184_v24, %s401_s14 }
  0x1d   : > { %205 = vrot.lane.b32.xlu1 %v188_v28, %s401_s14 }
  0x1e   : > { %203 = vrot.lane.b32.xlu0 %v187_v29, %s401_s14 }
  0x21   : > { %221 = vrot.lane.b32.xlu1 %v184_v24, %s402_s15 }
  0x22   : > { %219 = vrot.lane.b32.xlu0 %v183_v16, %s402_s15 }
  0x25   : > { %225 = vrot.lane.b32.xlu1 %v186_v20, %s402_s15 }
  0x26   : > { %223 = vrot.lane.b32.xlu0 %v185_v11, %s402_s15 }
  0x29   : > { %229 = vrot.lane.b32.xlu1 %v188_v28, %s402_s15 }
  0x2a   : > { %227 = vrot.lane.b32.xlu0 %v187_v29, %s402_s15 }
  0x87   : > { %v200_v30 = vpop.permute.xlu1 %199 }
  0x88   : > { %v196_v31 = vpop.permute.xlu0 %195  ;;  %v215_v43 = vmax.bf16 %v200_v30, %v185_v11 }
  0x89   : > { %v213_v37 = vmax.bf16 %v196_v31, %v183_v16 }
  0x8b   : > { %v202_v32 = vpop.permute.xlu1 %201 }
  0x8c   : > { %v198_v33 = vpop.permute.xlu0 %197  ;;  %v216_v42 = vmax.bf16 %v202_v32, %v186_v20 }
  0x8d   : > { %v214_v36 = vmax.bf16 %v198_v33, %v184_v24 }
  0x8f   : > { %v206_v34 = vpop.permute.xlu1 %205 }
  0x90   : > { %v204_v35 = vpop.permute.xlu0 %203  ;;  %v218_v48 = vmax.bf16 %v206_v34, %v188_v28 }
  0x91   : > { %v217_v49 = vmax.bf16 %v204_v35, %v187_v29 }
  0x93   : > { %v222_v38 = vpop.permute.xlu1 %221 }
  0x94   : > { %v238_v39 = vmax.bf16 %v222_v38, %v214_v36  ;;  %v220_v40 = vpop.permute.xlu0 %219 }
  0x95   : > { %v237_v41 = vmax.bf16 %v220_v40, %v213_v37 }
  0x96   : > { %245 = vst.msk [vmem:[%s157_s19 + $0x4] sm:$0x7] %vm243_vm0, %v238_v39 }
  0x97   : > { %244 = vst.msk [vmem:[%s157_s19] sm:$0x7] %vm243_vm0, %v237_v41  ;;  %v226_v44 = vpop.permute.xlu1 %225 }
  0x98   : > { %v240_v45 = vmax.bf16 %v226_v44, %v216_v42  ;;  %v224_v46 = vpop.permute.xlu0 %223 }
  0x99   : > { %v239_v47 = vmax.bf16 %v224_v46, %v215_v43 }
  0x9a   : > { %247 = vst.msk [vmem:[%s157_s19 + $0xc] sm:$0x7] %vm243_vm0, %v240_v45 }
  0x9b   : > { %246 = vst.msk [vmem:[%s157_s19 + $0x8] sm:$0x7] %vm243_vm0, %v239_v47  ;;  %v230_v50 = vpop.permute.xlu1 %229 }
  0x9c   : > { %v242_v51 = vmax.bf16 %v230_v50, %v218_v48  ;;  %v228_v52 = vpop.permute.xlu0 %227 }
  0x9d   : > { %v241_v53 = vmax.bf16 %v228_v52, %v217_v49 }
  0x9e   : > { %249 = vst.msk [vmem:[%s157_s19 + $0x14] sm:$0x7] %vm243_vm0, %v242_v51 }
  0x9f   : > { %248 = vst.msk [vmem:[%s157_s19 + $0x10] sm:$0x7] %vm243_vm0, %v241_v53 }
  0xa0 PF: > { %s11_s8 = sadd.s32 1, %s399_s8   ;;  %s478_s6 = smov %s395_s7 }
  0xa1   : > { %p8_p5 = scmp.ge.s32.totalorder %s11_s8, 4   ;;  %s479_s7 = smov %s481_s9 }
  0xa3   :  { %10 = sbr.rel (!%p8_p5) target bundleno = 2 (0x2), region = 54 }

// kernel: down_forward.6
= control target key start
LH: loop header
LB: loop body
LE: loop exit
PB: predicated region body
PF: predicated region fallthrough
CT: control target
= control target key end

     0   :  { %vm82_vm0 = vcmask 1041408   ;;  %v298_v0 = vmov 0.0   ;;  %vm299_vm1 = vmmov 0   ;;  %vm66_vm2 = vcmask 293888   ;;  %s406_s1 = inlined_call_operand.vmem [shape: bf16[36,8], index: 1, kind: input, shape index: {}]   ;;  %s407_s0 = inlined_call_operand.vmem [shape: bf16[72,36], index: 0, kind: input, shape index: {}]   ;;  %s408_s2 = inlined_call_operand.vmem [shape: f32[72,8], index: 2, kind: output, shape index: {0}]   ;;  %s409_s3 = inlined_call_operand.vmem [shape: f32[1,2,8], index: 3, kind: output, shape index: {1}]  }
   0x1   :  { %256 = vmatprep.subr.bf16.mxu0 %v298_v0  ;;  %v290_v1 = vld [vmem:[%s406_s1 + $0x10] ss:$0 sps:$4 sm:$0x33]   ;;  %262 = vmatprep.mubr.msk.bf16.mxu0 %vm299_vm1, %v298_v0  ;;  %v291_v3 = vld [vmem:[%s406_s1 + $0x8] sm:$0xff]   ;;  %v292_v4 = vld [vmem:[%s406_s1] sm:$0xff]   ;;  %vm158_vm3 = vcmask 64512  }
   0x2   :  { %282 = vmatprep.subr.bf16.mxu1 %v298_v0  ;;  %274 = vmatprep.mubr.msk.bf16.mxu1 %vm299_vm1, %v298_v0  ;;  %v84_v2 = vsel %vm82_vm0, %v290_v1, 0  ;;  %v293_v5 = vld [vmem:[%s407_s0] sm:$0xff]   ;;  %v295_v6 = vld [vmem:[%s407_s0 + $0x18] sm:$0xff]   ;;  %v294_v7 = vld [vmem:[%s407_s0 + $0x8] sm:$0xff]   ;;  %vm223_vm4 = vcmask 1040384   ;;  %vm225_vm5 = vcmask 58368  }
   0x3   :  { %257 = vmatpush3.bf16.msra.mxu0 %v84_v2  ;;  %285 = vmatpush3.bf16.msra.mxu1 %v84_v2  ;;  %v297_v8 = vld [vmem:[%s407_s0 + $0x20] ss:$0 sps:$4 sm:$0xff]   ;;  %v296_v9 = vld [vmem:[%s407_s0 + $0x10] sm:$0xff]  }
   0x4   :  { %258 = vmatprep.subr.bf16.mxu0 %v298_v0  ;;  %283 = vmatprep.subr.bf16.mxu1 %v298_v0 }
   0x7   :  { %259 = vmatpush3.bf16.msra.mxu0 %v291_v3  ;;  %286 = vmatpush3.bf16.msra.mxu1 %v291_v3 }
   0x8   :  { %260 = vmatprep.subr.bf16.mxu0 %v298_v0  ;;  %284 = vmatprep.subr.bf16.mxu1 %v298_v0 }
   0xb   :  { %261 = vmatpush3.bf16.msra.mxu0 %v292_v4  ;;  %287 = vmatpush3.bf16.msra.mxu1 %v292_v4 }
   0xe   :  { %263 = vmatmul.mubr.msk.bf16.vlgmr.msra.gmra.mxu0 %vm66_vm2, %v293_v5  ;;  %275 = vmatmul.mubr.msk.bf16.vlgmr.msra.gmra.mxu1 %vm66_vm2, %v295_v6 }
   0xf   :  { %266 = vmatprep.mubr.msk.bf16.mxu0 %vm299_vm1, %v298_v0  ;;  %278 = vmatprep.mubr.msk.bf16.mxu1 %vm299_vm1, %v298_v0 }
  0x16   :  { %267 = vmatmul.mubr.msk.bf16.gmra.mxu0 %vm66_vm2, %v294_v7  ;;  %279 = vmatmul.mubr.msk.bf16.gmra.mxu1 %vm66_vm2, %v297_v8 }
  0x17   :  { %270 = vmatprep.mubr.msk.bf16.mxu0 %vm299_vm1, %v298_v0 }
  0x1e   :  { %271 = vmatmul.mubr.msk.bf16.gmra.mxu0 %vm66_vm2, %v296_v9 }
  0xce   :  { %v120_v10 = vpop.f32.mrf.mxu0  ;;  %v144_v11 = vpop.f32.mrf.mxu1 }
  0xcf   :  { %159 = vst.msk [vmem:[%s408_s2] sm:$0xff] %vm158_vm3, %v120_v10  ;;  %165 = vst.msk [vmem:[%s408_s2 + $0x30] sm:$0xff] %vm158_vm3, %v144_v11  ;;  %v191_v23 = vmul.f32 %v120_v10, %v120_v10  ;;  %v168_v28 = vsel %vm158_vm3, %v120_v10, 0.0  ;;  %v197_v51 = vmul.f32 %v144_v11, %v144_v11  ;;  %v179_v57 = vsel %vm158_vm3, %v144_v11, 0.0 }
  0xd0   :  { %v264_v12 = vpop.f32.mrf.mxu0  ;;  %v276_v13 = vpop.f32.mrf.mxu1 }
  0xd1   :  { %v200_v35 = vsel %vm158_vm3, %v191_v23, 0.0  ;;  %v211_v63 = vsel %vm158_vm3, %v197_v51, 0.0 }
  0xd2   :  { %v123_v14 = vpop.f32.mrf.mxu0  ;;  %v147_v15 = vpop.f32.mrf.mxu1 }
  0xd3   :  { %160 = vst.msk [vmem:[%s408_s2 + $0x8] sm:$0xff] %vm158_vm3, %v123_v14  ;;  %166 = vst.msk [vmem:[%s408_s2 + $0x38] sm:$0xff] %vm158_vm3, %v147_v15  ;;  %v192_v20 = vmul.f32 %v123_v14, %v123_v14  ;;  %v169_v24 = vsel %vm158_vm3, %v123_v14, 0.0  ;;  %v198_v58 = vmul.f32 %v147_v15, %v147_v15  ;;  %v181_v0 = vsel %vm158_vm3, %v147_v15, 0.0 }
  0xd4   :  { %v265_v16 = vpop.f32.mrf.mxu0  ;;  %v277_v17 = vpop.f32.mrf.mxu1  ;;  %v170_v32 = vadd.f32 %v169_v24, %v168_v28 }
  0xd5   :  { %v201_v29 = vsel %vm158_vm3, %v192_v20, 0.0  ;;  %v213_v4 = vsel %vm158_vm3, %v198_v58, 0.0 }
  0xd6   :  { %v128_v18 = vpop.f32.mrf.mxu0  ;;  %v152_v19 = vpop.f32.mrf.mxu1  ;;  %v202_v38 = vadd.f32 %v201_v29, %v200_v35 }
  0xd7   :  { %161 = vst.msk [vmem:[%s408_s2 + $0x10] sm:$0xff] %vm158_vm3, %v128_v18  ;;  %167 = vst.msk [vmem:[%s408_s2 + $0x40] sm:$0xff] %vm158_vm3, %v152_v19  ;;  %v193_v25 = vmul.f32 %v128_v18, %v128_v18  ;;  %v171_v30 = vsel %vm158_vm3, %v128_v18, 0.0  ;;  %v199_v60 = vmul.f32 %v152_v19, %v152_v19  ;;  %v183_v1 = vsel %vm158_vm3, %v152_v19, 0.0 }
  0xd8   :  { %v268_v21 = vpop.f32.mrf.mxu0  ;;  %v280_v22 = vpop.f32.mrf.mxu1  ;;  %v172_v39 = vadd.f32 %v171_v30, %v170_v32 }
  0xd9   :  { %v203_v36 = vsel %vm158_vm3, %v193_v25, 0.0  ;;  %v215_v5 = vsel %vm158_vm3, %v199_v60, 0.0 }
  0xda   :  { %v131_v26 = vpop.f32.mrf.mxu0  ;;  %v155_v27 = vpop.f32.mrf.mxu1  ;;  %v204_v44 = vadd.f32 %v203_v36, %v202_v38 }
  0xdb   :  { %162 = vst.msk [vmem:[%s408_s2 + $0x18] sm:$0xff] %vm158_vm3, %v131_v26  ;;  %v194_v31 = vmul.f32 %v131_v26, %v131_v26  ;;  %v173_v37 = vsel %vm158_vm3, %v131_v26, 0.0 }
  0xdc   :  { %v269_v33 = vpop.f32.mrf.mxu0  ;;  %v281_v34 = vpop.f32.mrf.mxu1  ;;  %v174_v45 = vadd.f32 %v173_v37, %v172_v39 }
  0xdd   :  { %v205_v41 = vsel %vm158_vm3, %v194_v31, 0.0 }
  0xde   :  { %v136_v40 = vpop.f32.mrf.mxu0  ;;  %v206_v48 = vadd.f32 %v205_v41, %v204_v44 }
  0xdf   :  { %163 = vst.msk [vmem:[%s408_s2 + $0x20] sm:$0xff] %vm158_vm3, %v136_v40  ;;  %v175_v42 = vsel %vm158_vm3, %v136_v40, 0.0  ;;  %v195_v43 = vmul.f32 %v136_v40, %v136_v40 }
  0xe0   :  { %v272_v46 = vpop.f32.mrf.mxu0  ;;  %v176_v49 = vadd.f32 %v175_v42, %v174_v45 }
  0xe1   :  { %v207_v47 = vsel %vm158_vm3, %v195_v43, 0.0 }
  0xe2   :  { %v139_v50 = vpop.f32.mrf.mxu0  ;;  %v208_v54 = vadd.f32 %v207_v47, %v206_v48 }
  0xe3   :  { %164 = vst.msk [vmem:[%s408_s2 + $0x28] sm:$0xff] %vm158_vm3, %v139_v50  ;;  %v177_v52 = vsel %vm158_vm3, %v139_v50, 0.0  ;;  %v196_v53 = vmul.f32 %v139_v50, %v139_v50 }
  0xe4   :  { %v178_v55 = vadd.f32 %v177_v52, %v176_v49  ;;  %v273_v56 = vpop.f32.mrf.mxu0 }
  0xe5   :  { %v209_v59 = vsel %vm158_vm3, %v196_v53, 0.0 }
  0xe6   :  { %v180_v61 = vadd.f32 %v179_v57, %v178_v55  ;;  %v210_v62 = vadd.f32 %v209_v59, %v208_v54 }
  0xe8   :  { %v212_v2 = vadd.f32 %v211_v63, %v210_v62  ;;  %v182_v3 = vadd.f32 %v181_v0, %v180_v61 }
  0xea   :  { %v184_v6 = vadd.f32 %v183_v1, %v182_v3  ;;  %v214_v7 = vadd.f32 %v213_v4, %v212_v2 }
  0xec   :  { %v185_v8 = vrot.slane %v184_v6, 4  ;;  %v216_v9 = vadd.f32 %v215_v5, %v214_v7 }
  0xee   :  { %v186_v10 = vadd.f32 %v185_v8, %v184_v6  ;;  %v217_v11 = vrot.slane %v216_v9, 4 }
  0xf0   :  { %v187_v12 = vrot.slane %v186_v10, 2  ;;  %v218_v13 = vadd.f32 %v217_v11, %v216_v9 }
  0xf2   :  { %v188_v14 = vadd.f32 %v187_v12, %v186_v10  ;;  %v219_v16 = vrot.slane %v218_v13, 2 }
  0xf4   :  { %v189_v17 = vrot.slane %v188_v14, 1  ;;  %v220_v15 = vadd.f32 %v219_v16, %v218_v13 }
  0xf6   :  { %v221_v18 = vrot.slane %v220_v15, 1  ;;  %v190_v19 = vadd.f32 %v189_v17, %v188_v14 }
  0xf8   :  { %v222_v20 = vadd.f32 %v221_v18, %v220_v15 }
  0xfa   :  { %v224_v21 = vsel %vm223_vm4, %v190_v19, %v222_v20 }
  0xfb   :  { %226 = vst.msk [vmem:[%s409_s3] sm:$0x3] %vm225_vm5, %v224_v21 }

// kernel: down_forward.7
= control target key start
LH: loop header
LB: loop body
LE: loop exit
PB: predicated region body
PF: predicated region fallthrough
CT: control target
= control target key end

     0   :  { %vm101_vm0 = vcmask 60416   ;;  %s224_s0 = inlined_call_operand.vmem [shape: f32[72,8], index: 0, kind: input, shape index: {}]   ;;  %s225_s1 = inlined_call_operand.vmem [shape: f32[1,8], index: 1, kind: input, shape index: {}]   ;;  %s226_s2 = inlined_call_operand.vmem [shape: f32[1,8], index: 2, kind: input, shape index: {}]   ;;  %s227_s3 = inlined_call_operand.vmem [shape: bf16[72,8], index: 3, kind: output, shape index: {}]  }
   0x1   :  { %v14_v0 = vld [vmem:[%s224_s0] sm:$0xff]  ;;  %v15_v4 = vld [vmem:[%s224_s0 + $0x8] sm:$0xff]  ;;  %v16_v5 = vld [vmem:[%s224_s0 + $0x10] sm:$0xff] }
   0x2   :  { %v115_v1 = vld [vmem:[%s225_s1] ss:$0 sm:$0xff]  ;;  %v17_v6 = vld [vmem:[%s224_s0 + $0x18] sm:$0xff]  ;;  %v19_v11 = vld [vmem:[%s224_s0 + $0x28] sm:$0xff] }
   0x3   :  { %v116_v2 = vld [vmem:[%s226_s2] ss:$0 sm:$0xff]  ;;  %v30_v3 = vmul.f32 %v115_v1, %v14_v0  ;;  %v31_v7 = vmul.f32 %v115_v1, %v15_v4  ;;  %v32_v8 = vmul.f32 %v115_v1, %v16_v5  ;;  %v33_v9 = vmul.f32 %v115_v1, %v17_v6  ;;  %v20_v12 = vld [vmem:[%s224_s0 + $0x30] sm:$0xff]  ;;  %v21_v17 = vld [vmem:[%s224_s0 + $0x38] sm:$0xff] }
   0x4   :  { %v18_v10 = vld [vmem:[%s224_s0 + $0x20] sm:$0xff]  ;;  %v35_v15 = vmul.f32 %v115_v1, %v19_v11  ;;  %v36_v16 = vmul.f32 %v115_v1, %v20_v12  ;;  %v37_v21 = vmul.f32 %v115_v1, %v21_v17 }
   0x5   :  { %v46_v13 = vadd.f32 %v116_v2, %v30_v3  ;;  %v34_v14 = vmul.f32 %v115_v1, %v18_v10  ;;  %v47_v18 = vadd.f32 %v116_v2, %v31_v7  ;;  %v48_v19 = vadd.f32 %v116_v2, %v32_v8  ;;  %v22_v30 = vld [vmem:[%s224_s0 + $0x40] sm:$0xff] }
   0x6   :  { %v49_v20 = vadd.f32 %v116_v2, %v33_v9  ;;  %v51_v24 = vadd.f32 %v116_v2, %v35_v15  ;;  %v52_v25 = vadd.f32 %v116_v2, %v36_v16  ;;  %v53_v29 = vadd.f32 %v116_v2, %v37_v21 }
   0x7   :  { %v55_v22 = vmax.f32 %v46_v13, 0.0  ;;  %v50_v23 = vadd.f32 %v116_v2, %v34_v14  ;;  %v56_v26 = vmax.f32 %v47_v18, 0.0  ;;  %v57_v27 = vmax.f32 %v48_v19, 0.0 }
   0x8   :  { %v58_v28 = vmax.f32 %v49_v20, 0.0  ;;  %v60_v33 = vmax.f32 %v51_v24, 0.0  ;;  %v61_v34 = vmax.f32 %v52_v25, 0.0  ;;  %v62_v38 = vmax.f32 %v53_v29, 0.0 }
   0x9   :  { %v126_v31 = vpack.c.bf16 %v55_v22, %v55_v22  ;;  %v59_v32 = vmax.f32 %v50_v23, 0.0  ;;  %v127_v35 = vpack.c.bf16 %v56_v26, %v56_v26  ;;  %v128_v36 = vpack.c.bf16 %v57_v27, %v57_v27 }
   0xa   :  { %v129_v37 = vpack.c.bf16 %v58_v28, %v58_v28  ;;  %v131_v40 = vpack.c.bf16 %v60_v33, %v60_v33  ;;  %v132_v41 = vpack.c.bf16 %v61_v34, %v61_v34  ;;  %v38_v42 = vmul.f32 %v115_v1, %v22_v30 }
   0xb   :  { %102 = vst.msk [vmem:[%s227_s3] sm:$0xf] %vm101_vm0, %v126_v31  ;;  %v130_v39 = vpack.c.bf16 %v59_v32, %v59_v32  ;;  %103 = vst.msk [vmem:[%s227_s3 + $0x4] sm:$0xf] %vm101_vm0, %v127_v35  ;;  %v133_v43 = vpack.c.bf16 %v62_v38, %v62_v38 }
   0xc   :  { %104 = vst.msk [vmem:[%s227_s3 + $0x8] sm:$0xf] %vm101_vm0, %v128_v36  ;;  %105 = vst.msk [vmem:[%s227_s3 + $0xc] sm:$0xf] %vm101_vm0, %v129_v37  ;;  %v54_v44 = vadd.f32 %v116_v2, %v38_v42 }
   0xd   :  { %106 = vst.msk [vmem:[%s227_s3 + $0x10] sm:$0xf] %vm101_vm0, %v130_v39  ;;  %107 = vst.msk [vmem:[%s227_s3 + $0x14] sm:$0xf] %vm101_vm0, %v131_v40 }
   0xe   :  { %108 = vst.msk [vmem:[%s227_s3 + $0x18] sm:$0xf] %vm101_vm0, %v132_v41  ;;  %109 = vst.msk [vmem:[%s227_s3 + $0x1c] sm:$0xf] %vm101_vm0, %v133_v43  ;;  %v63_v45 = vmax.f32 %v54_v44, 0.0 }
  0x10   :  { %v134_v46 = vpack.c.bf16 %v63_v45, %v63_v45 }
  0x12   :  { %110 = vst.msk [vmem:[%s227_s3 + $0x20] sm:$0xf] %vm101_vm0, %v134_v46 }

// kernel: down_forward.9
= control target key start
LH: loop header
LB: loop body
LE: loop exit
PB: predicated region body
PF: predicated region fallthrough
CT: control target
= control target key end

     0   :  { %vm64_vm0 = vcmask 64512   ;;  %s169_s0 = inlined_call_operand.vmem [shape: f32[72,8], index: 0, kind: input, shape index: {}]   ;;  %s170_s1 = inlined_call_operand.vmem [shape: f32[1,8], index: 1, kind: input, shape index: {}]   ;;  %s171_s2 = inlined_call_operand.vmem [shape: f32[1,8], index: 2, kind: input, shape index: {}]   ;;  %s172_s3 = inlined_call_operand.vmem [shape: f32[72,8], index: 3, kind: output, shape index: {}]  }
   0x1   :  { %v14_v0 = vld [vmem:[%s169_s0] sm:$0xff]  ;;  %v15_v4 = vld [vmem:[%s169_s0 + $0x8] sm:$0xff]  ;;  %v16_v5 = vld [vmem:[%s169_s0 + $0x10] sm:$0xff] }
   0x2   :  { %v78_v1 = vld [vmem:[%s170_s1] ss:$0 sm:$0xff]  ;;  %v17_v6 = vld [vmem:[%s169_s0 + $0x18] sm:$0xff]  ;;  %v19_v11 = vld [vmem:[%s169_s0 + $0x28] sm:$0xff] }
   0x3   :  { %v79_v2 = vld [vmem:[%s171_s2] ss:$0 sm:$0xff]  ;;  %v30_v3 = vmul.f32 %v78_v1, %v14_v0  ;;  %v31_v7 = vmul.f32 %v78_v1, %v15_v4  ;;  %v32_v8 = vmul.f32 %v78_v1, %v16_v5  ;;  %v33_v9 = vmul.f32 %v78_v1, %v17_v6  ;;  %v20_v12 = vld [vmem:[%s169_s0 + $0x30] sm:$0xff]  ;;  %v21_v17 = vld [vmem:[%s169_s0 + $0x38] sm:$0xff] }
   0x4   :  { %v18_v10 = vld [vmem:[%s169_s0 + $0x20] sm:$0xff]  ;;  %v35_v15 = vmul.f32 %v78_v1, %v19_v11  ;;  %v36_v16 = vmul.f32 %v78_v1, %v20_v12  ;;  %v37_v21 = vmul.f32 %v78_v1, %v21_v17 }
   0x5   :  { %v46_v13 = vadd.f32 %v79_v2, %v30_v3  ;;  %v34_v14 = vmul.f32 %v78_v1, %v18_v10  ;;  %v47_v18 = vadd.f32 %v79_v2, %v31_v7  ;;  %v48_v19 = vadd.f32 %v79_v2, %v32_v8  ;;  %v22_v22 = vld [vmem:[%s169_s0 + $0x40] sm:$0xff] }
   0x6   :  { %v49_v20 = vadd.f32 %v79_v2, %v33_v9  ;;  %v51_v25 = vadd.f32 %v79_v2, %v35_v15  ;;  %v52_v26 = vadd.f32 %v79_v2, %v36_v16  ;;  %v53_v30 = vadd.f32 %v79_v2, %v37_v21 }
   0x7   :  { %v55_v23 = vmax.f32 %v46_v13, 0.0  ;;  %v50_v24 = vadd.f32 %v79_v2, %v34_v14  ;;  %v56_v27 = vmax.f32 %v47_v18, 0.0  ;;  %v57_v28 = vmax.f32 %v48_v19, 0.0 }
   0x8   :  { %v58_v29 = vmax.f32 %v49_v20, 0.0  ;;  %v60_v32 = vmax.f32 %v51_v25, 0.0  ;;  %v61_v33 = vmax.f32 %v52_v26, 0.0  ;;  %v38_v34 = vmul.f32 %v78_v1, %v22_v22 }
   0x9   :  { %65 = vst.msk [vmem:[%s172_s3] sm:$0xff] %vm64_vm0, %v55_v23  ;;  %v59_v31 = vmax.f32 %v50_v24, 0.0  ;;  %66 = vst.msk [vmem:[%s172_s3 + $0x8] sm:$0xff] %vm64_vm0, %v56_v27  ;;  %v62_v35 = vmax.f32 %v53_v30, 0.0 }
   0xa   :  { %67 = vst.msk [vmem:[%s172_s3 + $0x10] sm:$0xff] %vm64_vm0, %v57_v28  ;;  %68 = vst.msk [vmem:[%s172_s3 + $0x18] sm:$0xff] %vm64_vm0, %v58_v29  ;;  %v54_v36 = vadd.f32 %v79_v2, %v38_v34 }
   0xb   :  { %69 = vst.msk [vmem:[%s172_s3 + $0x20] sm:$0xff] %vm64_vm0, %v59_v31  ;;  %70 = vst.msk [vmem:[%s172_s3 + $0x28] sm:$0xff] %vm64_vm0, %v60_v32 }
   0xc   :  { %71 = vst.msk [vmem:[%s172_s3 + $0x30] sm:$0xff] %vm64_vm0, %v61_v33  ;;  %72 = vst.msk [vmem:[%s172_s3 + $0x38] sm:$0xff] %vm64_vm0, %v62_v35  ;;  %v63_v37 = vmax.f32 %v54_v36, 0.0 }
   0xe   :  { %73 = vst.msk [vmem:[%s172_s3 + $0x40] sm:$0xff] %vm64_vm0, %v63_v37 }

// kernel: down_forward.8
= control target key start
LH: loop header
LB: loop body
LE: loop exit
PB: predicated region body
PF: predicated region fallthrough
CT: control target
= control target key end

     0   :  { %vm98_vm0 = vcmask 1043456   ;;  %v328_v0 = vmov 0.0   ;;  %vm329_vm1 = vmmov 0   ;;  %vm82_vm2 = vcmask 588800   ;;  %s442_s1 = inlined_call_operand.vmem [shape: bf16[72,8], index: 1, kind: input, shape index: {}]   ;;  %s443_s0 = inlined_call_operand.vmem [shape: bf16[72,72], index: 0, kind: input, shape index: {}]   ;;  %s444_s2 = inlined_call_operand.vmem [shape: f32[72,8], index: 2, kind: output, shape index: {0}]   ;;  %s445_s3 = inlined_call_operand.vmem [shape: f32[1,2,8], index: 3, kind: output, shape index: {1}]  }
   0x1   :  { %276 = vmatprep.subr.bf16.mxu0 %v328_v0  ;;  %v318_v1 = vld [vmem:[%s442_s1 + $0x20] ss:$0 sps:$4 sm:$0xff]   ;;  %306 = vmatprep.subr.bf16.mxu1 %v328_v0  ;;  %v319_v3 = vld [vmem:[%s442_s1 + $0x18] sm:$0xff]   ;;  %v320_v4 = vld [vmem:[%s442_s1 + $0x10] sm:$0xff]   ;;  %vm174_vm3 = vcmask 64512   ;;  %vm239_vm4 = vcmask 1040384  }
   0x2   :  { %286 = vmatprep.mubr.msk.bf16.mxu0 %vm329_vm1, %v328_v0  ;;  %298 = vmatprep.mubr.msk.bf16.mxu1 %vm329_vm1, %v328_v0  ;;  %v100_v2 = vsel %vm98_vm0, %v318_v1, 0  ;;  %v321_v5 = vld [vmem:[%s442_s1 + $0x8] sm:$0xff]   ;;  %v322_v6 = vld [vmem:[%s442_s1] sm:$0xff]   ;;  %v325_v8 = vld [vmem:[%s443_s0 + $0x18] sm:$0xff]   ;;  %vm241_vm5 = vcmask 58368  }
   0x3   :  { %277 = vmatpush3.bf16.msra.mxu0 %v100_v2  ;;  %311 = vmatpush3.bf16.msra.mxu1 %v100_v2  ;;  %v323_v7 = vld [vmem:[%s443_s0] sm:$0xff]   ;;  %v324_v9 = vld [vmem:[%s443_s0 + $0x8] sm:$0xff]   ;;  %v326_v11 = vld [vmem:[%s443_s0 + $0x10] sm:$0xff]  }
   0x4   :  { %278 = vmatprep.subr.bf16.mxu0 %v328_v0  ;;  %307 = vmatprep.subr.bf16.mxu1 %v328_v0  ;;  %v327_v10 = vld [vmem:[%s443_s0 + $0x20] ss:$0 sps:$4 sm:$0xff]  }
   0x7   :  { %279 = vmatpush3.bf16.msra.mxu0 %v319_v3  ;;  %312 = vmatpush3.bf16.msra.mxu1 %v319_v3 }
   0x8   :  { %280 = vmatprep.subr.bf16.mxu0 %v328_v0  ;;  %308 = vmatprep.subr.bf16.mxu1 %v328_v0 }
   0xb   :  { %281 = vmatpush3.bf16.msra.mxu0 %v320_v4  ;;  %313 = vmatpush3.bf16.msra.mxu1 %v320_v4 }
   0xc   :  { %282 = vmatprep.subr.bf16.mxu0 %v328_v0  ;;  %309 = vmatprep.subr.bf16.mxu1 %v328_v0 }
   0xf   :  { %283 = vmatpush3.bf16.msra.mxu0 %v321_v5  ;;  %314 = vmatpush3.bf16.msra.mxu1 %v321_v5 }
  0x10   :  { %284 = vmatprep.subr.bf16.mxu0 %v328_v0  ;;  %310 = vmatprep.subr.bf16.mxu1 %v328_v0 }
  0x13   :  { %285 = vmatpush3.bf16.msra.mxu0 %v322_v6  ;;  %315 = vmatpush3.bf16.msra.mxu1 %v322_v6 }
  0x16   :  { %287 = vmatmul.mubr.msk.bf16.vlgmr.msra.gmra.mxu0 %vm82_vm2, %v323_v7  ;;  %299 = vmatmul.mubr.msk.bf16.vlgmr.msra.gmra.mxu1 %vm82_vm2, %v325_v8 }
  0x17   :  { %290 = vmatprep.mubr.msk.bf16.mxu0 %vm329_vm1, %v328_v0  ;;  %302 = vmatprep.mubr.msk.bf16.mxu1 %vm329_vm1, %v328_v0 }
  0x1e   :  { %291 = vmatmul.mubr.msk.bf16.gmra.mxu0 %vm82_vm2, %v324_v9  ;;  %303 = vmatmul.mubr.msk.bf16.gmra.mxu1 %vm82_vm2, %v327_v10 }
  0x1f   :  { %294 = vmatprep.mubr.msk.bf16.mxu0 %vm329_vm1, %v328_v0 }
  0x26   :  { %295 = vmatmul.mubr.msk.bf16.gmra.mxu0 %vm82_vm2, %v326_v11 }
  0xd6   :  { %v136_v12 = vpop.f32.mrf.mxu0  ;;  %v160_v13 = vpop.f32.mrf.mxu1 }
  0xd7   :  { %175 = vst.msk [vmem:[%s444_s2] sm:$0xff] %vm174_vm3, %v136_v12  ;;  %181 = vst.msk [vmem:[%s444_s2 + $0x30] sm:$0xff] %vm174_vm3, %v160_v13  ;;  %v207_v25 = vmul.f32 %v136_v12, %v136_v12  ;;  %v184_v30 = vsel %vm174_vm3, %v136_v12, 0.0  ;;  %v213_v53 = vmul.f32 %v160_v13, %v160_v13  ;;  %v195_v59 = vsel %vm174_vm3, %v160_v13, 0.0 }
  0xd8   :  { %v288_v14 = vpop.f32.mrf.mxu0  ;;  %v300_v15 = vpop.f32.mrf.mxu1 }
  0xd9   :  { %v216_v37 = vsel %vm174_vm3, %v207_v25, 0.0  ;;  %v227_v1 = vsel %vm174_vm3, %v213_v53, 0.0 }
  0xda   :  { %v139_v16 = vpop.f32.mrf.mxu0  ;;  %v163_v17 = vpop.f32.mrf.mxu1 }
  0xdb   :  { %176 = vst.msk [vmem:[%s444_s2 + $0x8] sm:$0xff] %vm174_vm3, %v139_v16  ;;  %182 = vst.msk [vmem:[%s444_s2 + $0x38] sm:$0xff] %vm174_vm3, %v163_v17  ;;  %v208_v22 = vmul.f32 %v139_v16, %v139_v16  ;;  %v185_v26 = vsel %vm174_vm3, %v139_v16, 0.0  ;;  %v214_v60 = vmul.f32 %v163_v17, %v163_v17  ;;  %v197_v2 = vsel %vm174_vm3, %v163_v17, 0.0 }
  0xdc   :  { %v289_v18 = vpop.f32.mrf.mxu0  ;;  %v301_v19 = vpop.f32.mrf.mxu1  ;;  %v186_v34 = vadd.f32 %v185_v26, %v184_v30 }
  0xdd   :  { %v217_v31 = vsel %vm174_vm3, %v208_v22, 0.0  ;;  %v229_v6 = vsel %vm174_vm3, %v214_v60, 0.0 }
  0xde   :  { %v144_v20 = vpop.f32.mrf.mxu0  ;;  %v168_v21 = vpop.f32.mrf.mxu1  ;;  %v218_v40 = vadd.f32 %v217_v31, %v216_v37 }
  0xdf   :  { %177 = vst.msk [vmem:[%s444_s2 + $0x10] sm:$0xff] %vm174_vm3, %v144_v20  ;;  %183 = vst.msk [vmem:[%s444_s2 + $0x40] sm:$0xff] %vm174_vm3, %v168_v21  ;;  %v209_v27 = vmul.f32 %v144_v20, %v144_v20  ;;  %v187_v32 = vsel %vm174_vm3, %v144_v20, 0.0  ;;  %v215_v62 = vmul.f32 %v168_v21, %v168_v21  ;;  %v199_v3 = vsel %vm174_vm3, %v168_v21, 0.0 }
  0xe0   :  { %v292_v23 = vpop.f32.mrf.mxu0  ;;  %v304_v24 = vpop.f32.mrf.mxu1  ;;  %v188_v41 = vadd.f32 %v187_v32, %v186_v34 }
  0xe1   :  { %v219_v38 = vsel %vm174_vm3, %v209_v27, 0.0  ;;  %v231_v7 = vsel %vm174_vm3, %v215_v62, 0.0 }
  0xe2   :  { %v147_v28 = vpop.f32.mrf.mxu0  ;;  %v171_v29 = vpop.f32.mrf.mxu1  ;;  %v220_v46 = vadd.f32 %v219_v38, %v218_v40 }
  0xe3   :  { %178 = vst.msk [vmem:[%s444_s2 + $0x18] sm:$0xff] %vm174_vm3, %v147_v28  ;;  %v210_v33 = vmul.f32 %v147_v28, %v147_v28  ;;  %v189_v39 = vsel %vm174_vm3, %v147_v28, 0.0 }
  0xe4   :  { %v293_v35 = vpop.f32.mrf.mxu0  ;;  %v305_v36 = vpop.f32.mrf.mxu1  ;;  %v190_v47 = vadd.f32 %v189_v39, %v188_v41 }
  0xe5   :  { %v221_v43 = vsel %vm174_vm3, %v210_v33, 0.0 }
  0xe6   :  { %v152_v42 = vpop.f32.mrf.mxu0  ;;  %v222_v50 = vadd.f32 %v221_v43, %v220_v46 }
  0xe7   :  { %179 = vst.msk [vmem:[%s444_s2 + $0x20] sm:$0xff] %vm174_vm3, %v152_v42  ;;  %v191_v44 = vsel %vm174_vm3, %v152_v42, 0.0  ;;  %v211_v45 = vmul.f32 %v152_v42, %v152_v42 }
  0xe8   :  { %v296_v48 = vpop.f32.mrf.mxu0  ;;  %v192_v51 = vadd.f32 %v191_v44, %v190_v47 }
  0xe9   :  { %v223_v49 = vsel %vm174_vm3, %v211_v45, 0.0 }
  0xea   :  { %v155_v52 = vpop.f32.mrf.mxu0  ;;  %v224_v56 = vadd.f32 %v223_v49, %v222_v50 }
  0xeb   :  { %180 = vst.msk [vmem:[%s444_s2 + $0x28] sm:$0xff] %vm174_vm3, %v155_v52  ;;  %v193_v54 = vsel %vm174_vm3, %v155_v52, 0.0  ;;  %v212_v55 = vmul.f32 %v155_v52, %v155_v52 }
  0xec   :  { %v194_v57 = vadd.f32 %v193_v54, %v192_v51  ;;  %v297_v58 = vpop.f32.mrf.mxu0 }
  0xed   :  { %v225_v61 = vsel %vm174_vm3, %v212_v55, 0.0 }
  0xee   :  { %v196_v63 = vadd.f32 %v195_v59, %v194_v57  ;;  %v226_v0 = vadd.f32 %v225_v61, %v224_v56 }
  0xf0   :  { %v228_v4 = vadd.f32 %v227_v1, %v226_v0  ;;  %v198_v5 = vadd.f32 %v197_v2, %v196_v63 }
  0xf2   :  { %v200_v8 = vadd.f32 %v199_v3, %v198_v5  ;;  %v230_v9 = vadd.f32 %v229_v6, %v228_v4 }
  0xf4   :  { %v201_v10 = vrot.slane %v200_v8, 4  ;;  %v232_v11 = vadd.f32 %v231_v7, %v230_v9 }
  0xf6   :  { %v202_v12 = vadd.f32 %v201_v10, %v200_v8  ;;  %v233_v13 = vrot.slane %v232_v11, 4 }
  0xf8   :  { %v203_v14 = vrot.slane %v202_v12, 2  ;;  %v234_v15 = vadd.f32 %v233_v13, %v232_v11 }
  0xfa   :  { %v204_v16 = vadd.f32 %v203_v14, %v202_v12  ;;  %v235_v18 = vrot.slane %v234_v15, 2 }
  0xfc   :  { %v205_v19 = vrot.slane %v204_v16, 1  ;;  %v236_v17 = vadd.f32 %v235_v18, %v234_v15 }
  0xfe   :  { %v237_v20 = vrot.slane %v236_v17, 1  ;;  %v206_v21 = vadd.f32 %v205_v19, %v204_v16 }
 0x100   :  { %v238_v22 = vadd.f32 %v237_v20, %v236_v17 }
 0x102   :  { %v240_v23 = vsel %vm239_vm4, %v206_v21, %v238_v22 }
 0x103   :  { %242 = vst.msk [vmem:[%s445_s3] sm:$0x3] %vm241_vm5, %v240_v23 }

</bundles_post_ra>
